<compile_context>
chip_gen: v5e
topology: v5e:2x2
jax: 0.10.0
libtpu: 0.0.40
codegen_flags: <defaults>
</compile_context>

<pallas_src>
import functools

import jax
import jax.numpy as jnp
from jax.experimental import pallas as pl
from jax.experimental.pallas import tpu as pltpu


def _gru_unit_kernel(support_ref, x_ref, mask_ref, wa_ref, wx_ref, wh1_ref,
                     bias_ref, out_ref, *, mxu_dtype):
    Bt, N, Dp = x_ref.shape
    x = x_ref[...]                               # (Bt, N, Dp) f32  (blend precision)
    x_m = x.astype(mxu_dtype)                    # MXU operand
    m = mask_ref[...]                            # (Bt, N, 1)  f32

    # Graph aggregation on the MXU: a = support @ x (f32 accumulation).
    # support_ref already holds the MXU dtype (host-cast) -> no in-kernel copy.
    a = jnp.einsum("bnm,bmd->bnd", support_ref[...], x_m,
                   preferred_element_type=jnp.float32)

    # Flatten the batch tile to rows; N is padded to a sublane multiple so these
    # reshapes are views, not VMEM copies.
    R = Bt * N
    x2 = x.reshape(R, Dp)
    x2_m = x_m.reshape(R, Dp)
    a2_m = a.astype(mxu_dtype).reshape(R, Dp)
    m2 = m.reshape(R, 1)

    # Two back-to-back gate matmuls (a-path then x-path): no concat copy, no
    # zero-block flops, MXU pipeline stays full (no VPU work between them).
    pre_a = jnp.dot(a2_m, wa_ref[...], preferred_element_type=jnp.float32)  # (R,3Dp)
    pre_x = jnp.dot(x2_m, wx_ref[...], preferred_element_type=jnp.float32)  # (R,2Dp)

    pre = pre_a + bias_ref[...]                       # biases pre-combined per gate
    zr = jax.nn.sigmoid(pre[:, :2 * Dp] + pre_x)      # one wide EUP stream
    z = zr[:, :Dp]
    r = zr[:, Dp:]

    h1 = jnp.dot((r * x2).astype(mxu_dtype), wh1_ref[...],
                 preferred_element_type=jnp.float32)
    h = jnp.tanh(m2 * (pre[:, 2 * Dp:] + h1))         # act = tanh

    out = x2 + z * (h - x2)                           # == h*z + x*(1-z)
    out_ref[...] = out.reshape(Bt, N, Dp).astype(out_ref.dtype)


def _prep_params(params, D, Dp, mxu_dtype):
    """Pack weights into a-path (Dp,3Dp), x-path (Dp,2Dp), h1 (Dp,Dp); biases (1,3Dp)."""
    def padw(w):
        return jnp.pad(w, ((0, Dp - D), (0, Dp - D)))

    def padb(b):
        return jnp.pad(b, (0, Dp - D))

    w_a = jnp.concatenate(
        [padw(params["z0_w"]), padw(params["r0_w"]), padw(params["h0_w"])],
        axis=1).astype(mxu_dtype)                                    # (Dp, 3Dp)
    w_x = jnp.concatenate(
        [padw(params["z1_w"]), padw(params["r1_w"])],
        axis=1).astype(mxu_dtype)                                    # (Dp, 2Dp)
    w_h1 = padw(params["h1_w"]).astype(mxu_dtype)                    # (Dp, Dp)

    bias = jnp.concatenate([
        padb(params["z0_b"] + params["z1_b"]),
        padb(params["r0_b"] + params["r1_b"]),
        padb(params["h0_b"] + params["h1_b"]),
    ]).reshape(1, 3 * Dp).astype(jnp.float32)                        # (1, 3Dp)
    return w_a, w_x, w_h1, bias


def _tpu_vmem_budget_and_cores():
    """(per-core VMEM budget for this kernel, #TensorCores) with safe fallbacks."""
    vmem_cap = 128 * 2**20
    try:
        vmem_cap = int(pltpu.get_tpu_info().vmem_capacity_bytes)
    except Exception:  # not on TPU / older API: assume v5e/v6e-class
        pass
    if vmem_cap <= 64 * 2**20:       # v7x-class: 64 MiB per TC, 2 TCs per chip
        return min(48 * 2**20, max(vmem_cap - 12 * 2**20, 24 * 2**20)), 2
    return min(96 * 2**20, max(vmem_cap - 32 * 2**20, 48 * 2**20)), 1


def _per_batch_vmem_bytes(N, Dp, sup_itemsize):
    """Per-batch-element working set: double-buffered I/O blocks + kernel temps."""
    io = 2 * (sup_itemsize * N * N    # support block
              + 4 * N * Dp            # x block
              + 4 * N                 # mask block
              + 4 * N * Dp)           # out block
    # In-kernel intermediates: f32 a / pre_a(3Dp) / pre_x(2Dp) / zr(2Dp) / h1 / h /
    # out (~11*N*Dp f32) plus bf16 casts of x, a, r*x (~3*N*Dp bf16).
    interm = 44 * N * Dp + 6 * N * Dp
    return io + interm


def _choose_batch_tile(B, N, Dp, sup_itemsize, weight_bytes, vmem_budget, num_tc):
    per_b = _per_batch_vmem_bytes(N, Dp, sup_itemsize)
    avail = max(per_b, vmem_budget - 2 * weight_bytes - (2 << 20))
    bt = min(B, max(1, avail // per_b))
    # >= 2 grid steps per TensorCore for DMA/compute overlap when B allows, but do
    # not shrink the gate-matmul row count (Bt*N) below ~256 just to get steps.
    min_steps = 2 * num_tc
    if B >= min_steps:
        bt_steps = max(1, B // min_steps)
        rows_bt = -(-256 // N)                     # ceil(256 / N)
        bt = min(bt, max(bt_steps, min(rows_bt, bt)))
    while B % bt:
        bt -= 1
    return int(bt)


def gru_unit_pallas(support, x, mask, params, *, mxu_dtype=jnp.bfloat16,
                    out_dtype=None):
    """support: [B,N,N], x: [B,N,D], mask: [B,N,1]; params: dict of weights/biases."""
    B, N, D = x.shape
    assert support.shape == (B, N, N)
    assert mask.shape == (B, N, 1)
    out_dtype = x.dtype if out_dtype is None else out_dtype

    # TODO(synk): nn.Dropout on `support` is omitted (inference / eval semantics).

    # Lane-dense feature dim; sublane-friendly node dim (reshape stays a view).
    Dp = max(128, ((D + 127) // 128) * 128)
    n_mult = 16 if jnp.dtype(mxu_dtype) == jnp.dtype(jnp.bfloat16) else 8
    Np = ((N + n_mult - 1) // n_mult) * n_mult

    x_p = jnp.pad(x, ((0, 0), (0, Np - N), (0, Dp - D))) if (Dp != D or Np != N) else x
    mask_p = jnp.pad(mask, ((0, 0), (0, Np - N), (0, 0))) if Np != N else mask
    sup_p = jnp.pad(support, ((0, 0), (0, Np - N), (0, Np - N))) if Np != N else support
    # Host-side cast of the dominant HBM slab; in production, feed support in bf16.
    sup_p = sup_p.astype(mxu_dtype)

    w_a, w_x, w_h1, bias = _prep_params(params, D, Dp, mxu_dtype)
    w_itemsize = jnp.dtype(mxu_dtype).itemsize
    weight_bytes = w_itemsize * (6 * Dp * Dp) + 4 * 3 * Dp

    vmem_budget, num_tc = _tpu_vmem_budget_and_cores()
    Bt = _choose_batch_tile(B, Np, Dp, w_itemsize, weight_bytes, vmem_budget, num_tc)
    grid = (B // Bt,)

    # Explicit, generation-aware VMEM limit (well below physical VMEM on v7x).
    blk_bytes = Bt * _per_batch_vmem_bytes(Np, Dp, w_itemsize)
    vmem_limit = int(min(vmem_budget,
                         max(blk_bytes + 2 * weight_bytes + (4 << 20), 16 << 20)))

    kernel = functools.partial(_gru_unit_kernel, mxu_dtype=mxu_dtype)

    out_p = pl.pallas_call(
        kernel,
        out_shape=jax.ShapeDtypeStruct((B, Np, Dp), out_dtype),
        grid_spec=pltpu.PrefetchScalarGridSpec(
            num_scalar_prefetch=0,
            grid=grid,
            in_specs=[
                pl.BlockSpec((Bt, Np, Np), lambda b: (b, 0, 0)),   # support (MXU dtype)
                pl.BlockSpec((Bt, Np, Dp), lambda b: (b, 0, 0)),   # x (f32, padded)
                pl.BlockSpec((Bt, Np, 1), lambda b: (b, 0, 0)),    # mask
                pl.BlockSpec((Dp, 3 * Dp), lambda b: (0, 0)),      # a-path gate weights
                pl.BlockSpec((Dp, 2 * Dp), lambda b: (0, 0)),      # x-path gate weights
                pl.BlockSpec((Dp, Dp), lambda b: (0, 0)),          # h1 weight
                pl.BlockSpec((1, 3 * Dp), lambda b: (0, 0)),       # combined biases
            ],
            out_specs=pl.BlockSpec((Bt, Np, Dp), lambda b: (b, 0, 0)),
        ),
        compiler_params=pltpu.CompilerParams(
            dimension_semantics=("parallel",),
            vmem_limit_bytes=vmem_limit),
    )(sup_p, x_p, mask_p, w_a, w_x, w_h1, bias)

    # Lane-dense kernel store + wrapper slice (slice/pad disappear when D % 128 == 0
    # and N is already sublane-aligned).  Padded lanes/rows are exactly zero.
    if Dp == D and Np == N:
        return out_p
    return out_p[:, :N, :D]


def glorot(key, shape, dtype=jnp.float32):
    fan_in, fan_out = shape[0], shape[1]
    limit = jnp.sqrt(6.0 / (fan_in + fan_out))
    return jax.random.uniform(key, shape, dtype, minval=-limit, maxval=limit)


def make_params(key, output_dim):
    keys = jax.random.split(key, 6)
    names = ["z0", "z1", "r0", "r1", "h0", "h1"]
    params = {}
    for k, name in zip(keys, names):
        params[f"{name}_w"] = glorot(k, (output_dim, output_dim))
        params[f"{name}_b"] = jnp.zeros((output_dim,), jnp.float32)
    return params


def gru_unit_reference(support, x, mask, params):
    """Pure-JAX reference mirroring the PyTorch forward (eval mode, act=tanh)."""
    a = jnp.matmul(support, x)
    z = jax.nn.sigmoid(jnp.matmul(a, params["z0_w"]) + params["z0_b"]
                       + jnp.matmul(x, params["z1_w"]) + params["z1_b"])
    r = jax.nn.sigmoid(jnp.matmul(a, params["r0_w"]) + params["r0_b"]
                       + jnp.matmul(x, params["r1_w"]) + params["r1_b"])
    h = jnp.tanh(mask * (jnp.matmul(a, params["h0_w"]) + params["h0_b"]
                         + jnp.matmul(r * x, params["h1_w"]) + params["h1_b"]))
    return h * z + x * (1.0 - z)


if __name__ == "__main__":
    B, N, D = 2, 16, 32  # batch, nodes, output_dim
    key = jax.random.PRNGKey(0)
    k_sup, k_x, k_mask, k_par = jax.random.split(key, 4)

    support = jax.random.uniform(k_sup, (B, N, N), jnp.float32)
    x = jax.random.normal(k_x, (B, N, D), jnp.float32)
    mask = (jax.random.uniform(k_mask, (B, N, 1)) > 0.2).astype(jnp.float32)
    params = make_params(k_par, D)

    ref = gru_unit_reference(support, x, mask, params)

    # Exactness check of the structural changes (split matmuls / padding / tiling).
    out_f32 = jax.block_until_ready(
        gru_unit_pallas(support, x, mask, params, mxu_dtype=jnp.float32))
    assert out_f32.shape == (B, N, D)
    assert jnp.allclose(out_f32, ref, atol=1e-3, rtol=1e-3)

    # Fast path: bf16 support + bf16 MXU operands, f32 accumulation & element-wise.
    out_bf16 = jax.block_until_ready(
        gru_unit_pallas(support, x, mask, params, mxu_dtype=jnp.bfloat16))
    assert out_bf16.shape == (B, N, D)
    assert jnp.allclose(out_bf16, ref, atol=1e-1, rtol=5e-2)

    print("KERNEL_OK")
</pallas_src>

<mosaic_0001>
module attributes {stable_mosaic.version = 11 : i64} {
  func.func @_gru_unit_kernel(%arg0: i32, %arg1: memref<2x16x16xf32, #tpu.memory_space<vmem>>, %arg2: memref<2x16x128xf32, #tpu.memory_space<vmem>>, %arg3: memref<2x16x1xf32, #tpu.memory_space<vmem>>, %arg4: memref<128x384xf32, #tpu.memory_space<vmem>>, %arg5: memref<128x256xf32, #tpu.memory_space<vmem>>, %arg6: memref<128x128xf32, #tpu.memory_space<vmem>>, %arg7: memref<1x384xf32, #tpu.memory_space<vmem>>, %arg8: memref<2x16x128xf32, #tpu.memory_space<vmem>>) attributes {dimension_semantics = [#tpu.dimension_semantics<parallel>], iteration_bounds = array<i64: 1>, scalar_prefetch = 0 : i64, scratch_operands = 0 : i64, tpu.core_type = #tpu.core_type<tc>, window_params = [{transform_indices = @transform_0, window_bounds = array<i64: 2, 16, 16>}, {transform_indices = @transform_1, window_bounds = array<i64: 2, 16, 128>}, {transform_indices = @transform_2, window_bounds = array<i64: 2, 16, 1>}, {pipeline_mode = #tpu.pipeline_mode<synchronous>, transform_indices = @transform_3, window_bounds = array<i64: 128, 384>}, {pipeline_mode = #tpu.pipeline_mode<synchronous>, transform_indices = @transform_4, window_bounds = array<i64: 128, 256>}, {pipeline_mode = #tpu.pipeline_mode<synchronous>, transform_indices = @transform_5, window_bounds = array<i64: 128, 128>}, {pipeline_mode = #tpu.pipeline_mode<synchronous>, transform_indices = @transform_6, window_bounds = array<i64: 1, 384>}, {transform_indices = @transform_7, window_bounds = array<i64: 2, 16, 128>}]} {
    %c0 = arith.constant 0 : index
    %c0_0 = arith.constant 0 : index
    %c0_1 = arith.constant 0 : index
    %0 = vector.load %arg2[%c0, %c0_0, %c0_1] : memref<2x16x128xf32, #tpu.memory_space<vmem>>, vector<2x16x128xf32>
    %c0_2 = arith.constant 0 : index
    %c0_3 = arith.constant 0 : index
    %c0_4 = arith.constant 0 : index
    %1 = vector.load %arg3[%c0_2, %c0_3, %c0_4] : memref<2x16x1xf32, #tpu.memory_space<vmem>>, vector<2x16x1xf32>
    %c0_5 = arith.constant 0 : index
    %c0_6 = arith.constant 0 : index
    %c0_7 = arith.constant 0 : index
    %2 = vector.load %arg1[%c0_5, %c0_6, %c0_7] : memref<2x16x16xf32, #tpu.memory_space<vmem>>, vector<2x16x16xf32>
    "tpu.trace_start"() <{level = 10 : i32, message = "bnm,bmd->bnd"}> : () -> ()
    %cst = arith.constant dense<0.000000e+00> : vector<2x16x128xf32>
    %3 = tpu.matmul %2, %0, %cst {dimension_numbers = #tpu.dot_dimension_numbers<[2], [1], [1], [2], [0, 0, 0, 1, 1, 2], [0], [0]>} : vector<2x16x16xf32>, vector<2x16x128xf32>, vector<2x16x128xf32> -> vector<2x16x128xf32>
    "tpu.trace_stop"() : () -> ()
    %4 = vector.shape_cast %0 : vector<2x16x128xf32> to vector<32x128xf32>
    %5 = vector.shape_cast %0 : vector<2x16x128xf32> to vector<32x128xf32>
    %6 = vector.shape_cast %3 : vector<2x16x128xf32> to vector<32x128xf32>
    %7 = vector.shape_cast %1 : vector<2x16x1xf32> to vector<32x1xf32>
    %c0_8 = arith.constant 0 : index
    %c0_9 = arith.constant 0 : index
    %8 = vector.load %arg4[%c0_8, %c0_9] : memref<128x384xf32, #tpu.memory_space<vmem>>, vector<128x384xf32>
    %cst_10 = arith.constant dense<0.000000e+00> : vector<32x384xf32>
    %9 = tpu.matmul %6, %8, %cst_10 {dimension_numbers = #tpu.dot_dimension_numbers<[1], [0], [0], [1], [0, 0, 1, 1], [], []>} : vector<32x128xf32>, vector<128x384xf32>, vector<32x384xf32> -> vector<32x384xf32>
    %c0_11 = arith.constant 0 : index
    %c0_12 = arith.constant 0 : index
    %10 = vector.load %arg5[%c0_11, %c0_12] : memref<128x256xf32, #tpu.memory_space<vmem>>, vector<128x256xf32>
    %cst_13 = arith.constant dense<0.000000e+00> : vector<32x256xf32>
    %11 = tpu.matmul %5, %10, %cst_13 {dimension_numbers = #tpu.dot_dimension_numbers<[1], [0], [0], [1], [0, 0, 1, 1], [], []>} : vector<32x128xf32>, vector<128x256xf32>, vector<32x256xf32> -> vector<32x256xf32>
    %c0_14 = arith.constant 0 : index
    %c0_15 = arith.constant 0 : index
    %12 = vector.load %arg7[%c0_14, %c0_15] : memref<1x384xf32, #tpu.memory_space<vmem>>, vector<1x384xf32>
    %13 = vector.broadcast %12 : vector<1x384xf32> to vector<32x384xf32>
    %14 = arith.addf %9, %13 : vector<32x384xf32>
    %15 = vector.extract_strided_slice %14 {offsets = [0, 0], sizes = [32, 256], strides = [1, 1]} : vector<32x384xf32> to vector<32x256xf32>
    %16 = arith.addf %15, %11 : vector<32x256xf32>
    %17 = arith.negf %16 : vector<32x256xf32>
    %18 = math.exp %17 : vector<32x256xf32>
    %cst_16 = arith.constant 1.000000e+00 : f32
    %19 = vector.broadcast %cst_16 : f32 to vector<32x256xf32>
    %20 = arith.addf %19, %18 : vector<32x256xf32>
    %21 = arith.divf %19, %20 : vector<32x256xf32>
    %22 = vector.extract_strided_slice %21 {offsets = [0, 0], sizes = [32, 128], strides = [1, 1]} : vector<32x256xf32> to vector<32x128xf32>
    %23 = vector.extract_strided_slice %21 {offsets = [0, 128], sizes = [32, 128], strides = [1, 1]} : vector<32x256xf32> to vector<32x128xf32>
    %24 = arith.mulf %23, %4 : vector<32x128xf32>
    %c0_17 = arith.constant 0 : index
    %c0_18 = arith.constant 0 : index
    %25 = vector.load %arg6[%c0_17, %c0_18] : memref<128x128xf32, #tpu.memory_space<vmem>>, vector<128x128xf32>
    %cst_19 = arith.constant dense<0.000000e+00> : vector<32x128xf32>
    %26 = tpu.matmul %24, %25, %cst_19 {dimension_numbers = #tpu.dot_dimension_numbers<[1], [0], [0], [1], [0, 0, 1, 1], [], []>} : vector<32x128xf32>, vector<128x128xf32>, vector<32x128xf32> -> vector<32x128xf32>
    %27 = vector.extract_strided_slice %14 {offsets = [0, 256], sizes = [32, 128], strides = [1, 1]} : vector<32x384xf32> to vector<32x128xf32>
    %28 = arith.addf %27, %26 : vector<32x128xf32>
    %29 = vector.broadcast %7 : vector<32x1xf32> to vector<32x128xf32>
    %30 = arith.mulf %29, %28 : vector<32x128xf32>
    %31 = math.tanh %30 : vector<32x128xf32>
    %32 = arith.subf %31, %4 : vector<32x128xf32>
    %33 = arith.mulf %22, %32 : vector<32x128xf32>
    %34 = arith.addf %4, %33 : vector<32x128xf32>
    %35 = vector.shape_cast %34 : vector<32x128xf32> to vector<2x16x128xf32>
    %c0_20 = arith.constant 0 : index
    %c0_21 = arith.constant 0 : index
    %c0_22 = arith.constant 0 : index
    %36 = vector.load %arg8[%c0_20, %c0_21, %c0_22] : memref<2x16x128xf32, #tpu.memory_space<vmem>>, vector<2x16x128xf32>
    tpu.vector_store %arg8[%c0_20, %c0_21, %c0_22], %35 {strides = array<i32>} : memref<2x16x128xf32, #tpu.memory_space<vmem>>, vector<2x16x128xf32>,
    return
  }
  func.func @transform_0(%arg0: i32) -> (i32, i32, i32) {
    %c0_i32 = arith.constant 0 : i32
    %c0_i32_0 = arith.constant 0 : i32
    %c0_i32_1 = arith.constant 0 : i32
    return %arg0, %c0_i32, %c0_i32_0 : i32, i32, i32
  }
  func.func @transform_1(%arg0: i32) -> (i32, i32, i32) {
    %c0_i32 = arith.constant 0 : i32
    %c0_i32_0 = arith.constant 0 : i32
    %c0_i32_1 = arith.constant 0 : i32
    return %arg0, %c0_i32, %c0_i32_0 : i32, i32, i32
  }
  func.func @transform_2(%arg0: i32) -> (i32, i32, i32) {
    %c0_i32 = arith.constant 0 : i32
    %c0_i32_0 = arith.constant 0 : i32
    %c0_i32_1 = arith.constant 0 : i32
    return %arg0, %c0_i32, %c0_i32_0 : i32, i32, i32
  }
  func.func @transform_3(%arg0: i32) -> (i32, i32) {
    %c0_i32 = arith.constant 0 : i32
    %c0_i32_0 = arith.constant 0 : i32
    %c0_i32_1 = arith.constant 0 : i32
    return %c0_i32, %c0_i32_0 : i32, i32
  }
  func.func @transform_4(%arg0: i32) -> (i32, i32) {
    %c0_i32 = arith.constant 0 : i32
    %c0_i32_0 = arith.constant 0 : i32
    %c0_i32_1 = arith.constant 0 : i32
    return %c0_i32, %c0_i32_0 : i32, i32
  }
  func.func @transform_5(%arg0: i32) -> (i32, i32) {
    %c0_i32 = arith.constant 0 : i32
    %c0_i32_0 = arith.constant 0 : i32
    %c0_i32_1 = arith.constant 0 : i32
    return %c0_i32, %c0_i32_0 : i32, i32
  }
  func.func @transform_6(%arg0: i32) -> (i32, i32) {
    %c0_i32 = arith.constant 0 : i32
    %c0_i32_0 = arith.constant 0 : i32
    %c0_i32_1 = arith.constant 0 : i32
    return %c0_i32, %c0_i32_0 : i32, i32
  }
  func.func @transform_7(%arg0: i32) -> (i32, i32, i32) {
    %c0_i32 = arith.constant 0 : i32
    %c0_i32_0 = arith.constant 0 : i32
    %c0_i32_1 = arith.constant 0 : i32
    return %arg0, %c0_i32, %c0_i32_0 : i32, i32, i32
  }
}

</mosaic_0001>

<bundles_post_ra>
// kernel: tpu_custom_call.1
= control target key start
LH: loop header
LB: loop body
LE: loop exit
PB: predicated region body
PF: predicated region fallthrough
CT: control target
= control target key end

     0   :  { %12 = vsyncpa [#allocation3], 0  ;;  %s1069_s0 = inlined_call_operand.vmem [shape: f32[2,16,16], index: 0, kind: input, shape index: {}]   ;;  %s1070_s1 = inlined_call_operand.hbm [shape: f32[2,16,128], index: 1, kind: input, shape index: {}]   ;;  %s1071_s2 = inlined_call_operand.vmem [shape: f32[2,16,1], index: 2, kind: input, shape index: {}]   ;;  %s1072_s3 = inlined_call_operand.hbm [shape: f32[128,384], index: 3, kind: input, shape index: {}]   ;;  %s1073_s4 = inlined_call_operand.hbm [shape: f32[128,256], index: 4, kind: input, shape index: {}]   ;;  %s1074_s5 = inlined_call_operand.hbm [shape: f32[128,128], index: 5, kind: input, shape index: {}]   ;;  %s1075_s6 = inlined_call_operand.vmem [shape: f32[1,384], index: 6, kind: input, shape index: {}]   ;;  %s1076_s7 = inlined_call_operand.hbm [shape: f32[2,16,128], index: 7, kind: output, shape index: {}]  }
   0x1   :  { %13 = vsyncpa [#allocation6], 0 }
   0x2   :  { %14 = vsyncpa [#allocation9], 0  ;;  %s37_s26 = sshll.u32 %s1072_s3, 4  ;;  %s38_s26 = int_to_ptr.hbm [resolvable:$true] %s37_s26 }
   0x3   :  { %15 = vsyncpa [#allocation4], 0  ;;  %s899_s27 = smov [#allocation5]   ;;  %s22_s8 = sshll.u32 %s1070_s1, 4  ;;  %s23_s8 = int_to_ptr.hbm [resolvable:$true] %s22_s8 }
   0x4   :  { %s39_s28 = sshll.u32 %s899_s27, 4  ;;  %s900_s9 = smov 384   ;;  %s40_s28 = int_to_ptr.vmem [resolvable:$true] %s39_s28 }
   0x5   :  { %s901_s10 = smov 24   ;;  %s902_s11 = smov [#allocation2]  }
   0x6   :  { %45 = dma.hbm_to_vmem [thread:$0]  %s38_s26, 6144, %s40_s28, [#allocation6], %s900_s9, %s900_s9, %s901_s10  }
   0x7   :  { %s24_s12 = sshll.u32 %s902_s11, 4  ;;  %s903_s13 = smov 128   ;;  %s25_s12 = int_to_ptr.vmem [resolvable:$true] %s24_s12 }
   0x8   :  { %s904_s14 = smov 8   ;;  %s50_s16 = sshll.u32 %s1073_s4, 4  ;;  %s51_s16 = int_to_ptr.hbm [resolvable:$true] %s50_s16 }
   0x9   :  { %30 = dma.hbm_to_vmem [thread:$0]  %s23_s8, 512, %s25_s12, [#allocation3], %s903_s13, %s903_s13, %s904_s14  }
   0xa   :  { %s905_s17 = smov [#allocation7]   ;;  %s63_s20 = sshll.u32 %s1074_s5, 4  ;;  %s64_s20 = int_to_ptr.hbm [resolvable:$true] %s63_s20 }
   0xb   :  { %s52_s1 = sshll.u32 %s905_s17, 4  ;;  %s906_s21 = smov 256   ;;  %s53_s1 = int_to_ptr.vmem [resolvable:$true] %s52_s1 }
   0xc   :  { %s907_s22 = smov 16   ;;  %s908_s23 = smov [#allocation8]  }
   0xd   :  { %58 = dma.hbm_to_vmem [thread:$0]  %s51_s16, 4096, %s53_s1, [#allocation6], %s906_s21, %s906_s21, %s907_s22  }
   0xe   :  { %s65_s24 = sshll.u32 %s908_s23, 4  ;;  %s66_s24 = int_to_ptr.vmem [resolvable:$true] %s65_s24 }
   0xf   :  { %71 = dma.hbm_to_vmem [thread:$0]  %s64_s20, 2048, %s66_s24, [#allocation9], %s903_s13, %s903_s13, %s904_s14  }
  0x10   :  { %891 = dma.done.wait [#allocation3], 512  }
  0x11   :  { %892 = vsyncadd [#allocation3], 4294966784 }
  0x12   :  { %893 = dma.done.wait [#allocation6], 10240  }
  0x13   :  { %894 = vsyncadd [#allocation6], 4294957056 }
  0x14   :  { %895 = dma.done.wait [#allocation9], 2048  }
  0x15   :  { %896 = vsyncadd [#allocation9], 4294965248  ;;  %v969_v0 = vld [vmem:[#allocation2 + $0x8] sm:$0xff]  ;;  %v971_v1 = vld [vmem:[#allocation2] sm:$0xff]  ;;  %vm102_vm0 = vcmask 130048   ;;  %s657_s19 = sshll.u32 %s1076_s7, 4  ;;  %s658_s19 = int_to_ptr.hbm [resolvable:$true] %s657_s19 }
  0x16   :  { %123 = vmatpush.msra.mxu0 %v969_v0  ;;  %v98_v2 = vld [vmem:[%s1069_s0] sm:$0xff]  ;;  %v977_v3 = vld [vmem:[#allocation2 + $0x18] sm:$0xff]  ;;  %v979_v4 = vld [vmem:[#allocation2 + $0x10] sm:$0xff] }
  0x17   :  { %152 = vmatpush.msra.mxu1 %v977_v3  ;;  %v100_v5 = vld [vmem:[%s1069_s0 + $0x10] sm:$0xff]  ;;  %v237_v7 = vld [vmem:[#allocation7 + $0xe0] sm:$0xff]  ;;  %v240_v10 = vld [vmem:[#allocation7 + $0xf8] sm:$0xff] }
  0x18   :  { %v239_v6 = vld [vmem:[#allocation7 + $0xf0] sm:$0xff]  ;;  %124 = vmatpush.msra.mxu0 %v971_v1  ;;  %v233_v9 = vld [vmem:[#allocation7 + $0xc0] sm:$0xff]  ;;  %270 = vmatpush.msra.mxu3 %v240_v10  ;;  %v238_v12 = vld [vmem:[#allocation7 + $0xe8] sm:$0xff] }
  0x19   :  { %241 = vmatpush.msra.mxu2 %v239_v6  ;;  %672 = vmatmul.msk.f32.vlgmr.msra.gmra.mxu0 %vm102_vm0, %v98_v2  ;;  %v235_v8 = vld [vmem:[#allocation7 + $0xd0] sm:$0xff]  ;;  %v236_v13 = vld [vmem:[#allocation7 + $0xd8] sm:$0xff]  ;;  %v206_v14 = vld [vmem:[#allocation5 + $0x168] sm:$0xff] }
  0x1a   :  { %153 = vmatpush.msra.mxu1 %v979_v4  ;;  %v231_v11 = vld [vmem:[#allocation7 + $0xb0] sm:$0xff]  ;;  %v99_v16 = vld [vmem:[%s1069_s0 + $0x8] sm:$0xff]  ;;  %271 = vmatpush.msra.mxu3 %v238_v12  ;;  %v204_v17 = vld [vmem:[#allocation5 + $0x158] sm:$0xff] }
  0x1b   :  { %674 = vmatmul.msk.f32.vlgmr.msra.gmra.mxu1 %vm102_vm0, %v100_v5  ;;  %242 = vmatpush.msra.mxu2 %v237_v7  ;;  %v207_v15 = vld [vmem:[#allocation5 + $0x170] sm:$0xff]  ;;  %v101_v18 = vld [vmem:[%s1069_s0 + $0x18] sm:$0xff]  ;;  %v229_v19 = vld [vmem:[#allocation7 + $0xa0] sm:$0xff] }
  0x1c   :  { %307 = vmatpush.msrb.mxu0 %v206_v14  ;;  %336 = vmatpush.msrb.mxu1 %v207_v15  ;;  %v234_v20 = vld [vmem:[#allocation7 + $0xc8] sm:$0xff]  ;;  %v203_v21 = vld [vmem:[#allocation5 + $0x150] sm:$0xff]  ;;  %v201_v23 = vld [vmem:[#allocation5 + $0x140] sm:$0xff] }
  0x1d   :  { %243 = vmatpush.msra.mxu2 %v235_v8  ;;  %272 = vmatpush.msra.mxu3 %v236_v13  ;;  %v227_v22 = vld [vmem:[#allocation7 + $0x90] sm:$0xff]  ;;  %v232_v24 = vld [vmem:[#allocation7 + $0xb8] sm:$0xff]  ;;  %v225_v26 = vld [vmem:[#allocation7 + $0x80] sm:$0xff] }
  0x1e   :  { %337 = vmatpush.msrb.mxu1 %v204_v17  ;;  %v200_v25 = vld [vmem:[#allocation5 + $0x138] sm:$0xff]  ;;  %308 = vmatpush.msrb.mxu0 %v203_v21  ;;  %v198_v27 = vld [vmem:[#allocation5 + $0x128] sm:$0xff]  ;;  %v197_v29 = vld [vmem:[#allocation5 + $0x120] sm:$0xff] }
  0x1f   :  { %244 = vmatpush.msra.mxu2 %v233_v9  ;;  %273 = vmatpush.msra.mxu3 %v234_v20  ;;  %v230_v28 = vld [vmem:[#allocation7 + $0xa8] sm:$0xff]  ;;  %v223_v30 = vld [vmem:[#allocation7 + $0x70] sm:$0xff]  ;;  %v228_v32 = vld [vmem:[#allocation7 + $0x98] sm:$0xff] }
  0x20   :  { %338 = vmatpush.msrb.mxu1 %v201_v23  ;;  %309 = vmatpush.msrb.mxu0 %v200_v25  ;;  %v195_v31 = vld [vmem:[#allocation5 + $0x110] sm:$0xff]  ;;  %v194_v33 = vld [vmem:[#allocation5 + $0x108] sm:$0xff]  ;;  %v221_v34 = vld [vmem:[#allocation7 + $0x60] sm:$0xff] }
  0x21   :  { %245 = vmatpush.msra.mxu2 %v231_v11  ;;  %673 = vmatmul.msk.f32.gmra.mxu0 %vm102_vm0, %v99_v16  ;;  %v192_v35 = vld [vmem:[#allocation5 + $0xf8] sm:$0xff]  ;;  %v226_v36 = vld [vmem:[#allocation7 + $0x88] sm:$0xff]  ;;  %v191_v37 = vld [vmem:[#allocation5 + $0xf0] sm:$0xff] }
  0x22   :  { %274 = vmatpush.msra.mxu3 %v232_v24  ;;  %339 = vmatpush.msrb.mxu1 %v198_v27  ;;  %v219_v38 = vld [vmem:[#allocation7 + $0x50] sm:$0xff]  ;;  %v189_v39 = vld [vmem:[#allocation5 + $0xe0] sm:$0xff]  ;;  %v224_v40 = vld [vmem:[#allocation7 + $0x78] sm:$0xff] }
  0x23   :  { %675 = vmatmul.msk.f32.gmra.mxu1 %vm102_vm0, %v101_v18  ;;  %246 = vmatpush.msra.mxu2 %v229_v19  ;;  %v188_v41 = vld [vmem:[#allocation5 + $0xd8] sm:$0xff]  ;;  %v217_v42 = vld [vmem:[#allocation7 + $0x40] sm:$0xff]  ;;  %v186_v43 = vld [vmem:[#allocation5 + $0xc8] sm:$0xff] }
  0x24   :  { %275 = vmatpush.msra.mxu3 %v230_v28  ;;  %310 = vmatpush.msrb.mxu0 %v197_v29  ;;  %v222_v44 = vld [vmem:[#allocation7 + $0x68] sm:$0xff]  ;;  %v185_v45 = vld [vmem:[#allocation5 + $0xc0] sm:$0xff]  ;;  %v215_v46 = vld [vmem:[#allocation7 + $0x30] sm:$0xff] }
  0x25   :  { %247 = vmatpush.msra.mxu2 %v227_v22  ;;  %340 = vmatpush.msrb.mxu1 %v195_v31  ;;  %v183_v47 = vld [vmem:[#allocation5 + $0xb0] sm:$0xff]  ;;  %v220_v48 = vld [vmem:[#allocation7 + $0x58] sm:$0xff]  ;;  %v182_v49 = vld [vmem:[#allocation5 + $0xa8] sm:$0xff] }
  0x26   :  { %276 = vmatpush.msra.mxu3 %v228_v32  ;;  %311 = vmatpush.msrb.mxu0 %v194_v33  ;;  %v213_v50 = vld [vmem:[#allocation7 + $0x20] sm:$0xff]  ;;  %v180_v51 = vld [vmem:[#allocation5 + $0x98] sm:$0xff]  ;;  %v218_v52 = vld [vmem:[#allocation7 + $0x48] sm:$0xff] }
  0x27   :  { %248 = vmatpush.msra.mxu2 %v225_v26  ;;  %341 = vmatpush.msrb.mxu1 %v192_v35  ;;  %v179_v53 = vld [vmem:[#allocation5 + $0x90] sm:$0xff]  ;;  %v177_v55 = vld [vmem:[#allocation5 + $0x80] sm:$0xff]  ;;  %v216_v56 = vld [vmem:[#allocation7 + $0x38] sm:$0xff] }
  0x28   :  { %277 = vmatpush.msra.mxu3 %v226_v36  ;;  %312 = vmatpush.msrb.mxu0 %v191_v37  ;;  %v211_v54 = vld [vmem:[#allocation7 + $0x10] sm:$0xff]  ;;  %v176_v57 = vld [vmem:[#allocation5 + $0x78] sm:$0xff]  ;;  %v209_v58 = vld [vmem:[#allocation7] sm:$0xff] }
  0x29   :  { %249 = vmatpush.msra.mxu2 %v223_v30  ;;  %342 = vmatpush.msrb.mxu1 %v189_v39  ;;  %v174_v59 = vld [vmem:[#allocation5 + $0x68] sm:$0xff]  ;;  %v208_v61 = vld [vmem:[#allocation5 + $0x178] sm:$0xff]  ;;  %v173_v62 = vld [vmem:[#allocation5 + $0x60] sm:$0xff] }
  0x2a   :  { %278 = vmatpush.msra.mxu3 %v224_v40  ;;  %313 = vmatpush.msrb.mxu0 %v188_v41  ;;  %v214_v60 = vld [vmem:[#allocation7 + $0x28] sm:$0xff]  ;;  %v212_v63 = vld [vmem:[#allocation7 + $0x18] sm:$0xff]  ;;  %v171_v2 = vld [vmem:[#allocation5 + $0x50] sm:$0xff] }
  0x2b   :  { %250 = vmatpush.msra.mxu2 %v221_v34  ;;  %343 = vmatpush.msrb.mxu1 %v186_v43  ;;  %v205_v5 = vld [vmem:[#allocation5 + $0x160] sm:$0xff]  ;;  %v170_v6 = vld [vmem:[#allocation5 + $0x48] sm:$0xff]  ;;  %v168_v8 = vld [vmem:[#allocation5 + $0x38] sm:$0xff] }
  0x2c   :  { %279 = vmatpush.msra.mxu3 %v222_v44  ;;  %314 = vmatpush.msrb.mxu0 %v185_v45  ;;  %v210_v7 = vld [vmem:[#allocation7 + $0x8] sm:$0xff]  ;;  %v167_v10 = vld [vmem:[#allocation5 + $0x30] sm:$0xff]  ;;  %v165_v11 = vld [vmem:[#allocation5 + $0x20] sm:$0xff] }
  0x2d   :  { %251 = vmatpush.msra.mxu2 %v219_v38  ;;  %344 = vmatpush.msrb.mxu1 %v183_v47  ;;  %v202_v9 = vld [vmem:[#allocation5 + $0x148] sm:$0xff]  ;;  %v199_v12 = vld [vmem:[#allocation5 + $0x130] sm:$0xff]  ;;  %v164_v13 = vld [vmem:[#allocation5 + $0x18] sm:$0xff] }
  0x2e   :  { %280 = vmatpush.msra.mxu3 %v220_v48  ;;  %315 = vmatpush.msrb.mxu0 %v182_v49  ;;  %v196_v14 = vld [vmem:[#allocation5 + $0x118] sm:$0xff]  ;;  %v193_v15 = vld [vmem:[#allocation5 + $0x100] sm:$0xff]  ;;  %v190_v16 = vld [vmem:[#allocation5 + $0xe8] sm:$0xff] }
  0x2f   :  { %252 = vmatpush.msra.mxu2 %v217_v42  ;;  %345 = vmatpush.msrb.mxu1 %v180_v51  ;;  %v187_v17 = vld [vmem:[#allocation5 + $0xd0] sm:$0xff]  ;;  %v184_v18 = vld [vmem:[#allocation5 + $0xb8] sm:$0xff]  ;;  %v181_v19 = vld [vmem:[#allocation5 + $0xa0] sm:$0xff] }
  0x30   :  { %281 = vmatpush.msra.mxu3 %v218_v52  ;;  %316 = vmatpush.msrb.mxu0 %v179_v53  ;;  %v178_v20 = vld [vmem:[#allocation5 + $0x88] sm:$0xff]  ;;  %v161_v21 = vld [vmem:[#allocation5] sm:$0xff]  ;;  %v175_v23 = vld [vmem:[#allocation5 + $0x70] sm:$0xff] }
  0x31   :  { %253 = vmatpush.msra.mxu2 %v215_v46  ;;  %346 = vmatpush.msrb.mxu1 %v177_v55  ;;  %v162_v22 = vld [vmem:[#allocation5 + $0x8] sm:$0xff]  ;;  %v172_v24 = vld [vmem:[#allocation5 + $0x58] sm:$0xff]  ;;  %v169_v25 = vld [vmem:[#allocation5 + $0x40] sm:$0xff] }
  0x32   :  { %282 = vmatpush.msra.mxu3 %v216_v56  ;;  %317 = vmatpush.msrb.mxu0 %v176_v57  ;;  %v166_v26 = vld [vmem:[#allocation5 + $0x28] sm:$0xff]  ;;  %v163_v27 = vld [vmem:[#allocation5 + $0x10] sm:$0xff]  ;;  %v573_v32 = vld [vmem:[#allocation8 + $0x78] sm:$0xff] }
  0x33   :  { %254 = vmatpush.msra.mxu2 %v213_v50  ;;  %347 = vmatpush.msrb.mxu1 %v174_v59  ;;  %v572_v33 = vld [vmem:[#allocation8 + $0x70] sm:$0xff]  ;;  %v571_v34 = vld [vmem:[#allocation8 + $0x68] sm:$0xff]  ;;  %v570_v35 = vld [vmem:[#allocation8 + $0x60] sm:$0xff] }
  0x34   :  { %283 = vmatpush.msra.mxu3 %v214_v60  ;;  %318 = vmatpush.msrb.mxu0 %v173_v62  ;;  %v569_v36 = vld [vmem:[#allocation8 + $0x58] sm:$0xff]  ;;  %v568_v37 = vld [vmem:[#allocation8 + $0x50] sm:$0xff]  ;;  %v567_v38 = vld [vmem:[#allocation8 + $0x48] sm:$0xff] }
  0x35   :  { %255 = vmatpush.msra.mxu2 %v211_v54  ;;  %348 = vmatpush.msrb.mxu1 %v171_v2  ;;  %v566_v39 = vld [vmem:[#allocation8 + $0x40] sm:$0xff]  ;;  %v565_v40 = vld [vmem:[#allocation8 + $0x38] sm:$0xff]  ;;  %v564_v41 = vld [vmem:[#allocation8 + $0x30] sm:$0xff] }
  0x36   :  { %284 = vmatpush.msra.mxu3 %v212_v63  ;;  %319 = vmatpush.msrb.mxu0 %v170_v6  ;;  %v1008_v42 = vld [vmem:[%s1075_s6] sm:$0x7]  ;;  %v563_v43 = vld [vmem:[#allocation8 + $0x28] sm:$0xff]  ;;  %v561_v47 = vld [vmem:[#allocation8 + $0x18] sm:$0xff]  ;;  %v909_v6 = vmov 0  }
  0x37   :  { %256 = vmatpush.msra.mxu2 %v209_v58  ;;  %349 = vmatpush.msrb.mxu1 %v168_v8  ;;  %v562_v45 = vld [vmem:[#allocation8 + $0x20] sm:$0xff]  ;;  %v302_v46 = vperm.slane %v1008_v42, 1  ;;  %v560_v49 = vld [vmem:[#allocation8 + $0x10] sm:$0xff]  ;;  %v559_v51 = vld [vmem:[#allocation8 + $0x8] sm:$0xff] }
  0x38   :  { %257 = vmatmul.f32.vlgmr.msra.gmra.mxu2 %v971_v1  ;;  %285 = vmatpush.msra.mxu3 %v210_v7  ;;  %v558_v53 = vld [vmem:[#allocation8] sm:$0xff] }
  0x39   :  { %684 = vmatpush.msrb.mxu2 %v208_v61  ;;  %320 = vmatpush.msrb.mxu0 %v167_v10  ;;  %v94_v7 = vld [vmem:[%s1071_s2] sm:$0xff] }
  0x3a   :  { %286 = vmatmul.f32.vlgmr.msra.gmra.mxu3 %v971_v1  ;;  %350 = vmatpush.msrb.mxu1 %v165_v11 }
  0x3b   :  { %685 = vmatpush.msrb.mxu2 %v205_v5  ;;  %321 = vmatpush.msrb.mxu0 %v164_v13 }
  0x3c   :  { %351 = vmatpush.msrb.mxu1 %v162_v22  ;;  %700 = vmatpush.msrb.mxu3 %v573_v32 }
  0x3d   :  { %686 = vmatpush.msrb.mxu2 %v202_v9  ;;  %322 = vmatpush.msrb.mxu0 %v161_v21 }
  0x3e   :  { %574 = vmatpush.msra.mxu1 %v573_v32  ;;  %701 = vmatpush.msrb.mxu3 %v572_v33 }
  0x3f   :  { %687 = vmatpush.msrb.mxu2 %v199_v12  ;;  %365 = vmatpush.msra.mxu0 %v208_v61 }
  0x40   :  { %260 = vmatmul.f32.gmra.mxu2 %v969_v0  ;;  %575 = vmatpush.msra.mxu1 %v572_v33 }
  0x41   :  { %688 = vmatpush.msrb.mxu2 %v196_v14  ;;  %366 = vmatpush.msra.mxu0 %v205_v5 }
  0x42   :  { %289 = vmatmul.f32.gmra.mxu3 %v969_v0  ;;  %576 = vmatpush.msra.mxu1 %v571_v34 }
  0x43   :  { %689 = vmatpush.msrb.mxu2 %v193_v15  ;;  %367 = vmatpush.msra.mxu0 %v202_v9 }
  0x44   :  { %702 = vmatpush.msrb.mxu3 %v571_v34  ;;  %577 = vmatpush.msra.mxu1 %v570_v35  ;;  %v97_v34 = vld [vmem:[%s1071_s2 + $0x18] sm:$0xff] }
  0x45   :  { %690 = vmatpush.msrb.mxu2 %v190_v16  ;;  %368 = vmatpush.msra.mxu0 %v199_v12 }
  0x46   :  { %703 = vmatpush.msrb.mxu3 %v570_v35  ;;  %578 = vmatpush.msra.mxu1 %v569_v36 }
  0x47   :  { %691 = vmatpush.msrb.mxu2 %v187_v17  ;;  %369 = vmatpush.msra.mxu0 %v196_v14 }
  0x48   :  { %263 = vmatmul.f32.gmra.mxu2 %v979_v4  ;;  %704 = vmatpush.msrb.mxu3 %v569_v36 }
  0x49   :  { %692 = vmatpush.msrb.mxu2 %v184_v18  ;;  %370 = vmatpush.msra.mxu0 %v193_v15 }
  0x4a   :  { %292 = vmatmul.f32.gmra.mxu3 %v979_v4  ;;  %579 = vmatpush.msra.mxu1 %v568_v37 }
  0x4b   :  { %693 = vmatpush.msrb.mxu2 %v181_v19  ;;  %371 = vmatpush.msra.mxu0 %v190_v16 }
  0x4c   :  { %705 = vmatpush.msrb.mxu3 %v568_v37  ;;  %580 = vmatpush.msra.mxu1 %v567_v38 }
  0x4d   :  { %694 = vmatpush.msrb.mxu2 %v178_v20  ;;  %372 = vmatpush.msra.mxu0 %v187_v17 }
  0x4e   :  { %706 = vmatpush.msrb.mxu3 %v567_v38  ;;  %581 = vmatpush.msra.mxu1 %v566_v39 }
  0x4f   :  { %695 = vmatpush.msrb.mxu2 %v175_v23  ;;  %373 = vmatpush.msra.mxu0 %v184_v18 }
  0x50   :  { %266 = vmatmul.f32.gmra.mxu2 %v977_v3  ;;  %707 = vmatpush.msrb.mxu3 %v566_v39 }
  0x51   :  { %696 = vmatpush.msrb.mxu2 %v172_v24  ;;  %374 = vmatpush.msra.mxu0 %v181_v19 }
  0x52   :  { %295 = vmatmul.f32.gmra.mxu3 %v977_v3  ;;  %582 = vmatpush.msra.mxu1 %v565_v40 }
  0x53   :  { %697 = vmatpush.msrb.mxu2 %v169_v25  ;;  %375 = vmatpush.msra.mxu0 %v178_v20 }
  0x54   :  { %708 = vmatpush.msrb.mxu3 %v565_v40  ;;  %583 = vmatpush.msra.mxu1 %v564_v41 }
  0x55   :  { %698 = vmatpush.msrb.mxu2 %v166_v26  ;;  %376 = vmatpush.msra.mxu0 %v175_v23 }
  0x56   :  { %709 = vmatpush.msrb.mxu3 %v564_v41  ;;  %584 = vmatpush.msra.mxu1 %v563_v43 }
  0x57   :  { %699 = vmatpush.msrb.mxu2 %v163_v27  ;;  %377 = vmatpush.msra.mxu0 %v172_v24  ;;  %v96_v24 = vld [vmem:[%s1071_s2 + $0x10] sm:$0xff] }
  0x58   :  { %710 = vmatpush.msrb.mxu3 %v563_v43  ;;  %585 = vmatpush.msra.mxu1 %v562_v45 }
  0x59   :  { %378 = vmatpush.msra.mxu0 %v169_v25  ;;  %728 = vset.pattern.permute.xlu0 %v909_v6  ;;  %v95_v25 = vld [vmem:[%s1071_s2 + $0x8] sm:$0xff]  ;;  %s910_s2 = smov [#allocation10]  }
  0x5a   :  { %711 = vmatpush.msrb.mxu3 %v562_v45  ;;  %586 = vmatpush.msra.mxu1 %v561_v47  ;;  %s655_s17 = sshll.u32 %s910_s2, 4  ;;  %s656_s17 = int_to_ptr.vmem [resolvable:$true] %s655_s17 }
  0x5b   :  { %379 = vmatpush.msra.mxu0 %v166_v26  ;;  %729 = vset.pattern.permute.xlu1 %v909_v6 }
  0x5c   :  { %712 = vmatpush.msrb.mxu3 %v561_v47  ;;  %587 = vmatpush.msra.mxu1 %v560_v49 }
  0x5d   :  { %380 = vmatpush.msra.mxu0 %v163_v27  ;;  %609 = vperm.xlu0 %728, %v94_v7  }
  0x5e   :  { %713 = vmatpush.msrb.mxu3 %v560_v49  ;;  %588 = vmatpush.msra.mxu1 %v559_v51 }
  0x5f   :  { %619 = vperm.xlu1 %729, %v96_v24  }
  0x60   :  { %714 = vmatpush.msrb.mxu3 %v559_v51  ;;  %589 = vmatpush.msra.mxu1 %v558_v53 }
  0x62   :  { %715 = vmatpush.msrb.mxu3 %v558_v53 }
  0x65   :  { %614 = vperm.xlu0 %728, %v95_v25  }
  0x67   :  { %624 = vperm.xlu1 %729, %v97_v34  }
  0x96   :  { %v126_v28 = vpop.f32.mrf.mxu0 }
  0x97   :  { %323 = vmatmul.f32.vlgmr.msrb.gmra.mxu0 %v126_v28  ;;  %352 = vmatmul.f32.vlgmr.msrb.gmra.mxu1 %v126_v28 }
  0x98   :  { %v155_v30 = vpop.f32.mrf.mxu1 }
  0x9e   :  { %v129_v29 = vpop.f32.mrf.mxu0 }
  0x9f   :  { %326 = vmatmul.f32.gmra.mxu0 %v129_v29  ;;  %355 = vmatmul.f32.gmra.mxu1 %v129_v29 }
  0xa0   :  { %384 = vmatmul.f32.vlgmr.msrb.gmra.mxu2 %v129_v29  ;;  %v158_v31 = vpop.f32.mrf.mxu1 }
  0xa7   :  { %329 = vmatmul.f32.gmra.mxu0 %v155_v30  ;;  %358 = vmatmul.f32.gmra.mxu1 %v155_v30 }
  0xa8   :  { %387 = vmatmul.f32.gmra.mxu2 %v155_v30 }
  0xaf   :  { %332 = vmatmul.f32.gmra.mxu0 %v158_v31  ;;  %361 = vmatmul.f32.gmra.mxu1 %v158_v31 }
  0xb0   :  { %390 = vmatmul.f32.gmra.mxu2 %v158_v31 }
  0xb7   :  { %381 = vmatmul.f32.vlgmr.msra.gmra.mxu0 %v126_v28 }
  0xbd   :  { %v287_v44 = vpop.f32.mrf.mxu3 }
  0xc5   :  { %v290_v55 = vpop.f32.mrf.mxu3 }
  0xcd   :  { %v293_v62 = vpop.f32.mrf.mxu3 }
  0xd5   :  { %v296_v14 = vpop.f32.mrf.mxu3 }
 0x114   :  { %v353_v48 = vpop.f32.mrf.mxu1 }
 0x115   :  { %v354_v50 = vadd.f32 %v353_v48, %v302_v46 }
 0x117   :  { %v395_v52 = vadd.f32 %v354_v50, %v287_v44 }
 0x119   :  { %v677_v54 = vmul.f32 -1.442695, %v395_v52 }
 0x11b   :  { %730 = vpow2.f32 %v677_v54 }
 0x11c   :  { %v356_v56 = vpop.f32.mrf.mxu1 }
 0x11d   :  { %v357_v57 = vadd.f32 %v356_v56, %v302_v46 }
 0x11f   :  { %v397_v58 = vadd.f32 %v357_v57, %v290_v55 }
 0x121   :  { %v731_v59 = vpop.eup %730  ;;  %v679_v60 = vmul.f32 -1.442695, %v397_v58 }
 0x122   :  { %v427_v61 = vadd.f32 1.0, %v731_v59 }
 0x124   :  { %v359_v63 = vpop.f32.mrf.mxu1  ;;  %732 = vrcp.f32 %v427_v61  ;;  %v460_v19 = vand.u32 2147483648, %v427_v61  ;;  %v458_v22 = vand.u32 2147483647, %v427_v61  ;;  %vm454_vm2 = vweird.f32 %v427_v61 }
 0x125   :  { %v360_v2 = vadd.f32 %v359_v63, %v302_v46  ;;  %734 = vpow2.f32 %v679_v60 }
 0x126   :  { %v461_v28 = vor.u32 1.1754944e-38, %v460_v19  ;;  %vm459_vm4 = vcmp.eq.f32.partialorder %v458_v22, 8.507059e+37 }
 0x127   :  { %v399_v5 = vadd.f32 %v360_v2, %v293_v62 }
 0x129   :  { %v681_v8 = vmul.f32 -1.442695, %v399_v5 }
 0x12a   :  { %v733_v9 = vpop.eup %732 }
 0x12b   :  { %v735_v10 = vpop.eup %734  ;;  %v450_v11 = vmul.f32 %v733_v9, %v427_v61  ;;  %736 = vpow2.f32 %v681_v8  ;;  %vm455_vm1 = vweird.f32 %v733_v9  ;;  %v301_v8 = vperm.slane %v1008_v42, 0 }
 0x12c   :  { %v362_v12 = vpop.f32.mrf.mxu1  ;;  %v429_v13 = vadd.f32 1.0, %v735_v10  ;;  %vm456_vm3 = vmor %vm454_vm2, %vm455_vm1 }
 0x12d   :  { %v451_v15 = vsub.f32 1.0, %v450_v11  ;;  %v363_v16 = vadd.f32 %v362_v12, %v302_v46  ;;  %v258_v11 = vpop.f32.mrf.mxu2 }
 0x12e   :  { %738 = vrcp.f32 %v429_v13  ;;  %v490_v36 = vand.u32 2147483648, %v429_v13  ;;  %v488_v38 = vand.u32 2147483647, %v429_v13  ;;  %vm484_vm6 = vweird.f32 %v429_v13 }
 0x12f   :  { %v401_v17 = vadd.f32 %v363_v16, %v296_v14  ;;  %v452_v18 = vmul.f32 %v733_v9, %v451_v15 }
 0x130   :  { %v491_v44 = vor.u32 1.1754944e-38, %v490_v36  ;;  %vm489_vm8 = vcmp.eq.f32.partialorder %v488_v38, 8.507059e+37 }
 0x131   :  { %v683_v20 = vmul.f32 -1.442695, %v401_v17  ;;  %v453_v21 = vadd.f32 %v733_v9, %v452_v18  ;;  %v737_v23 = vpop.eup %736 }
 0x132   :  { %v431_v26 = vadd.f32 1.0, %v737_v23 }
 0x133   :  { %740 = vpow2.f32 %v683_v20  ;;  %v457_v30 = vsel %vm456_vm3, %v733_v9, %v453_v21  ;;  %v324_v9 = vpop.f32.mrf.mxu0 }
 0x134   :  { %v739_v27 = vpop.eup %738  ;;  %742 = vrcp.f32 %v431_v26  ;;  %v462_v31 = vsel %vm459_vm4, %v461_v28, %v457_v30  ;;  %v520_v48 = vand.u32 2147483648, %v431_v26  ;;  %v518_v51 = vand.u32 2147483647, %v431_v26 }
 0x135   :  { %v480_v29 = vmul.f32 %v739_v27, %v429_v13  ;;  %v554_v32 = vmul.f32 %v462_v31, %v971_v1  ;;  %vm485_vm5 = vweird.f32 %v739_v27  ;;  %vm514_vm10 = vweird.f32 %v431_v26  ;;  %v261_v15 = vpop.f32.mrf.mxu2 }
 0x136   :  { %vm486_vm7 = vmor %vm484_vm6, %vm485_vm5  ;;  %v521_v54 = vor.u32 1.1754944e-38, %v520_v48  ;;  %vm519_vm12 = vcmp.eq.f32.partialorder %v518_v51, 8.507059e+37  ;;  %v325_v10 = vadd.f32 %v324_v9, %v301_v8 }
 0x137   :  { %v481_v33 = vsub.f32 1.0, %v480_v29  ;;  %590 = vmatmul.f32.vlgmr.msra.gmra.mxu1 %v554_v32 }
 0x138   :  { %v394_v12 = vadd.f32 %v325_v10, %v258_v11 }
 0x139   :  { %v482_v35 = vmul.f32 %v739_v27, %v481_v33  ;;  %v741_v37 = vpop.eup %740 }
 0x13a   :  { %v743_v39 = vpop.eup %742  ;;  %v433_v40 = vadd.f32 1.0, %v741_v37  ;;  %v676_v14 = vmul.f32 -1.442695, %v394_v12 }
 0x13b   :  { %v483_v41 = vadd.f32 %v739_v27, %v482_v35  ;;  %v510_v43 = vmul.f32 %v743_v39, %v431_v26  ;;  %vm515_vm9 = vweird.f32 %v743_v39  ;;  %v327_v13 = vpop.f32.mrf.mxu0  ;;  %v1031_v35 = vperm.slane %v1008_v42, 2 }
 0x13c   :  { %744 = vrcp.f32 %v433_v40  ;;  %vm516_vm11 = vmor %vm514_vm10, %vm515_vm9  ;;  %v550_v60 = vand.u32 2147483648, %v433_v40  ;;  %v548_v62 = vand.u32 2147483647, %v433_v40  ;;  %vm544_vm14 = vweird.f32 %v433_v40 }
 0x13d   :  { %v487_v45 = vsel %vm486_vm7, %v739_v27, %v483_v41  ;;  %v511_v46 = vsub.f32 1.0, %v510_v43  ;;  %746 = vpow2.f32 %v676_v14  ;;  %v328_v16 = vadd.f32 %v327_v13, %v301_v8  ;;  %v264_v23 = vpop.f32.mrf.mxu2 }
 0x13e   :  { %v492_v47 = vsel %vm489_vm8, %v491_v44, %v487_v45  ;;  %v551_v2 = vor.u32 1.1754944e-38, %v550_v60  ;;  %vm549_vm0 = vcmp.eq.f32.partialorder %v548_v62, 8.507059e+37 }
 0x13f   :  { %v555_v49 = vmul.f32 %v492_v47, %v969_v0  ;;  %v512_v50 = vmul.f32 %v743_v39, %v511_v46  ;;  %v396_v19 = vadd.f32 %v328_v16, %v261_v15  ;;  %v620_v16 = vpop.permute.xlu1 %619 }
 0x141   :  { %593 = vmatmul.f32.vlgmr.msrb.gmra.mxu3 %v555_v49  ;;  %v513_v52 = vadd.f32 %v743_v39, %v512_v50  ;;  %v678_v21 = vmul.f32 -1.442695, %v396_v19 }
 0x142   :  { %v745_v53 = vpop.eup %744 }
 0x143   :  { %v517_v55 = vsel %vm516_vm11, %v743_v39, %v513_v52  ;;  %v540_v56 = vmul.f32 %v745_v53, %v433_v40  ;;  %vm545_vm13 = vweird.f32 %v745_v53  ;;  %v330_v17 = vpop.f32.mrf.mxu0  ;;  %v747_v18 = vpop.eup %746 }
 0x144   :  { %v522_v57 = vsel %vm519_vm12, %v521_v54, %v517_v55  ;;  %vm546_vm15 = vmor %vm544_vm14, %vm545_vm13  ;;  %v426_v20 = vadd.f32 1.0, %v747_v18  ;;  %v331_v22 = vadd.f32 %v330_v17, %v301_v8  ;;  %v610_v40 = vpop.permute.xlu0 %609 }
 0x145   :  { %v556_v58 = vmul.f32 %v522_v57, %v979_v4  ;;  %v541_v59 = vsub.f32 1.0, %v540_v56  ;;  %v267_v31 = vpop.f32.mrf.mxu2 }
 0x146   :  { %748 = vrcp.f32 %v426_v20  ;;  %v398_v25 = vadd.f32 %v331_v22, %v264_v23  ;;  %v445_v49 = vand.u32 2147483648, %v426_v20  ;;  %vm439_vm2 = vweird.f32 %v426_v20 }
 0x147   :  { %v542_v61 = vmul.f32 %v745_v53, %v541_v59  ;;  %750 = vpow2.f32 %v678_v21  ;;  %v443_v50 = vand.u32 2147483647, %v426_v20 }
 0x148   :  { %v680_v27 = vmul.f32 -1.442695, %v398_v25  ;;  %v446_v55 = vor.u32 1.1754944e-38, %v445_v49 }
 0x149   :  { %596 = vmatmul.f32.gmra.mxu3 %v556_v58  ;;  %v543_v63 = vadd.f32 %v745_v53, %v542_v61  ;;  %vm444_vm4 = vcmp.eq.f32.partialorder %v443_v50, 8.507059e+37 }
 0x14a   :  { %752 = vpow2.f32 %v680_v27 }
 0x14b   :  { %v547_v5 = vsel %vm546_vm15, %v745_v53, %v543_v63  ;;  %v333_v24 = vpop.f32.mrf.mxu0 }
 0x14c   :  { %v552_v6 = vsel %vm549_vm0, %v551_v2, %v547_v5  ;;  %v749_v26 = vpop.eup %748  ;;  %v334_v28 = vadd.f32 %v333_v24, %v301_v8  ;;  %v615_v2 = vpop.permute.xlu0 %614 }
 0x14d   :  { %v557_v7 = vmul.f32 %v552_v6, %v977_v3  ;;  %v751_v29 = vpop.eup %750  ;;  %v435_v30 = vmul.f32 %v749_v26, %v426_v20  ;;  %vm440_vm1 = vweird.f32 %v749_v26  ;;  %v385_v42 = vpop.f32.mrf.mxu2 }
 0x14e   :  { %v400_v32 = vadd.f32 %v334_v28, %v267_v31  ;;  %v1028_v33 = vadd.f32 1.0, %v751_v29  ;;  %vm441_vm3 = vmor %vm439_vm2, %vm440_vm1  ;;  %v386_v61 = vadd.f32 %v385_v42, %v1031_v35 }
 0x14f   :  { %v436_v36 = vsub.f32 1.0, %v435_v30 }
 0x150   :  { %v682_v37 = vmul.f32 -1.442695, %v400_v32  ;;  %754 = vrcp.f32 %v1028_v33  ;;  %v753_v41 = vpop.eup %752  ;;  %v475_v15 = vand.u32 2147483648, %v1028_v33  ;;  %vm469_vm6 = vweird.f32 %v1028_v33 }
 0x151   :  { %599 = vmatmul.f32.gmra.mxu3 %v557_v7  ;;  %v437_v44 = vmul.f32 %v749_v26, %v436_v36  ;;  %v1035_v46 = vadd.f32 1.0, %v753_v41 }
 0x152   :  { %756 = vpow2.f32 %v682_v37  ;;  %v476_v23 = vor.u32 1.1754944e-38, %v475_v15 }
 0x153   :  { %v382_v34 = vpop.f32.mrf.mxu0  ;;  %v438_v48 = vadd.f32 %v749_v26, %v437_v44  ;;  %v505_v31 = vand.u32 2147483648, %v1035_v46  ;;  %vm499_vm10 = vweird.f32 %v1035_v46 }
 0x154   :  { %v383_v38 = vadd.f32 %v382_v34, %v1031_v35  ;;  %v503_v34 = vand.u32 2147483647, %v1035_v46 }
 0x155   :  { %v442_v53 = vsel %vm441_vm3, %v749_v26, %v438_v48  ;;  %v388_v8 = vpop.f32.mrf.mxu2 }
 0x156   :  { %v755_v47 = vpop.eup %754  ;;  %v447_v59 = vsel %vm444_vm4, %v446_v55, %v442_v53  ;;  %v389_v14 = vadd.f32 %v388_v8, %v1031_v35  ;;  %vm504_vm12 = vcmp.eq.f32.partialorder %v503_v34, 8.507059e+37  ;;  %v770_v55 = vld [vmem:[#allocation2 + $0x18] sm:$0xff] }
 0x157   :  { %v465_v52 = vmul.f32 %v755_v47, %v1028_v33  ;;  %vm470_vm5 = vweird.f32 %v755_v47 }
 0x158   :  { %v757_v51 = vpop.eup %756  ;;  %vm471_vm7 = vmor %vm469_vm6, %vm470_vm5 }
 0x159   :  { %v1039_v56 = vadd.f32 1.0, %v757_v51  ;;  %v466_v58 = vsub.f32 1.0, %v465_v52 }
 0x15b   :  { %v467_v9 = vmul.f32 %v755_v47, %v466_v58  ;;  %vm529_vm14 = vweird.f32 %v1039_v56 }
 0x15d   :  { %v468_v12 = vadd.f32 %v755_v47, %v467_v9  ;;  %v391_v25 = vpop.f32.mrf.mxu2 }
 0x15e   :  { %v392_v32 = vadd.f32 %v391_v25, %v1031_v35 }
 0x15f   :  { %v472_v21 = vsel %vm471_vm7, %v755_v47, %v468_v12 }
 0x1b4   :  { %v591_v39 = vpop.f32.mrf.mxu1 }
 0x1b5   :  { %v603_v43 = vadd.f32 %v591_v39, %v383_v38 }
 0x1b7   :  { %v627_v45 = vmul.f32 %v610_v40, %v603_v43  ;;  %v625_v40 = vpop.permute.xlu1 %624  ;;  %v506_v43 = vor.u32 1.1754944e-38, %v505_v31 }
 0x1b9   :  { %758 = vtanh.f32 %v627_v45 }
 0x1ba   :  { %760 = vrcp.f32 %v1035_v46 }
 0x1bb   :  { %762 = vrcp.f32 %v1039_v56 }
 0x1bf   :  { %v759_v54 = vpop.eup %758 }
 0x1c0   :  { %v635_v57 = vsub.f32 %v759_v54, %v971_v1  ;;  %v761_v60 = vpop.eup %760 }
 0x1c1   :  { %v495_v7 = vmul.f32 %v761_v60, %v1035_v46  ;;  %v763_v13 = vpop.eup %762  ;;  %vm500_vm9 = vweird.f32 %v761_v60  ;;  %v533_v46 = vand.u32 2147483647, %v1039_v56 }
 0x1c2   :  { %v639_v62 = vmul.f32 %v635_v57, %v447_v59  ;;  %v525_v20 = vmul.f32 %v763_v13, %v1039_v56  ;;  %vm501_vm11 = vmor %vm499_vm10, %vm500_vm9  ;;  %vm530_vm13 = vweird.f32 %v763_v13 }
 0x1c3   :  { %v496_v11 = vsub.f32 1.0, %v495_v7  ;;  %vm531_vm15 = vmor %vm529_vm14, %vm530_vm13  ;;  %vm534_vm0 = vcmp.eq.f32.partialorder %v533_v46, 8.507059e+37 }
 0x1c4   :  { %v594_v63 = vpop.f32.mrf.mxu3  ;;  %v643_v5 = vadd.f32 %v639_v62, %v971_v1  ;;  %v473_v1 = vand.u32 2147483647, %v1028_v33  ;;  %v526_v28 = vsub.f32 1.0, %v525_v20 }
 0x1c5   :  { %v604_v6 = vadd.f32 %v594_v63, %v386_v61  ;;  %v497_v19 = vmul.f32 %v761_v60, %v496_v11 }
 0x1c6   :  { %647 = vst [vmem:[#allocation10] sm:$0xff] %v643_v5  ;;  %vm474_vm8 = vcmp.eq.f32.partialorder %v473_v1, 8.507059e+37  ;;  %v527_v38 = vmul.f32 %v763_v13, %v526_v28 }
 0x1c7   :  { %v628_v10 = vmul.f32 %v615_v2, %v604_v6  ;;  %v477_v27 = vsel %vm474_vm8, %v476_v23, %v472_v21  ;;  %v498_v30 = vadd.f32 %v761_v60, %v497_v19 }
 0x1c8   :  { %v528_v48 = vadd.f32 %v763_v13, %v527_v38 }
 0x1c9   :  { %764 = vtanh.f32 %v628_v10  ;;  %v502_v39 = vsel %vm501_vm11, %v761_v60, %v498_v30 }
 0x1ca   :  { %v507_v35 = vsel %vm504_vm12, %v506_v43, %v502_v39  ;;  %v532_v49 = vsel %vm531_vm15, %v763_v13, %v528_v48 }
 0x1cc   :  { %v597_v17 = vpop.f32.mrf.mxu3 }
 0x1cd   :  { %v605_v18 = vadd.f32 %v597_v17, %v389_v14 }
 0x1cf   :  { %v765_v22 = vpop.eup %764  ;;  %v629_v24 = vmul.f32 %v620_v16, %v605_v18 }
 0x1d0   :  { %v636_v26 = vsub.f32 %v765_v22, %v969_v0 }
 0x1d1   :  { %766 = vtanh.f32 %v629_v24 }
 0x1d2   :  { %v640_v29 = vmul.f32 %v636_v26, %v477_v27 }
 0x1d4   :  { %v644_v33 = vadd.f32 %v640_v29, %v969_v0  ;;  %v600_v36 = vpop.f32.mrf.mxu3  ;;  %v535_v0 = vand.u32 2147483648, %v1039_v56 }
 0x1d5   :  { %v606_v37 = vadd.f32 %v600_v36, %v392_v32 }
 0x1d6   :  { %648 = vst [vmem:[#allocation10 + $0x8] sm:$0xff] %v644_v33  ;;  %v536_v51 = vor.u32 1.1754944e-38, %v535_v0 }
 0x1d7   :  { %v767_v41 = vpop.eup %766  ;;  %v630_v44 = vmul.f32 %v625_v40, %v606_v37 }
 0x1d8   :  { %v637_v45 = vsub.f32 %v767_v41, %v979_v4  ;;  %v537_v53 = vsel %vm534_vm0, %v536_v51, %v532_v49 }
 0x1d9   :  { %768 = vtanh.f32 %v630_v44 }
 0x1da   :  { %v641_v47 = vmul.f32 %v637_v45, %v507_v35 }
 0x1dc   :  { %v645_v42 = vadd.f32 %v641_v47, %v979_v4 }
 0x1de   :  { %649 = vst [vmem:[#allocation10 + $0x10] sm:$0xff] %v645_v42 }
 0x1df   :  { %v769_v50 = vpop.eup %768 }
 0x1e0   :  { %v638_v52 = vsub.f32 %v769_v50, %v977_v3 }
 0x1e2   :  { %v642_v54 = vmul.f32 %v638_v52, %v537_v53 }
 0x1e4   :  { %v646_v56 = vadd.f32 %v770_v55, %v642_v54 }
 0x1e6   :  { %650 = vst [vmem:[#allocation10 + $0x18] sm:$0xff] %v646_v56 }
 0x1e7   :  { %663 = dma.vmem_to_hbm [thread:$0]  %s656_s17, 512, %s658_s19, [#allocation4], %s903_s13, %s903_s13, %s904_s14  }
 0x1e8   :  { %897 = dma.done.wait [#allocation4], 512  }
 0x1e9   :  { %898 = vsyncadd [#allocation4], 4294966784 }
 0x1ea   :  { %668 = vsyncpa [#allocation3], 1 }
 0x1eb   :  { %669 = vsyncpa [#allocation6], 1 }
 0x1ec   :  { %670 = vsyncpa [#allocation9], 1 }
 0x1ed   :  { %671 = vsyncpa [#allocation4], 1 }

</bundles_post_ra>
